<compile_context>
chip_gen: v7x
topology: tpu7x:2x2x1
jax: 0.10.0
libtpu: 0.0.40
codegen_flags: <defaults>
</compile_context>

<pallas_src>
import functools
import math

import jax
import jax.numpy as jnp
from jax.experimental import pallas as pl
from jax.experimental.pallas import tpu as pltpu


def _round_up(n, m):
    return ((n + m - 1) // m) * m


def _dropout(y, seed, p):
    # Inverted dropout with the TPU hardware PRNG.
    # TODO(synk): cannot reproduce torch's RNG stream bit-for-bit; semantics
    # (Bernoulli keep with prob 1-p, rescale by 1/(1-p)) are identical.
    if p >= 1.0:
        return jnp.zeros_like(y)
    pltpu.prng_seed(seed)
    bits = pltpu.bitcast(pltpu.prng_random_bits(y.shape), jnp.uint32)
    thresh = jnp.uint32(min(int(round(p * 4294967296.0)), 4294967295))
    keep = bits >= thresh          # P(keep) = 1 - p
    return jnp.where(keep, y * (1.0 / (1.0 - p)), 0.0)


def _temporal_block_kernel(
    seed_ref, x_ref, w1_ref, b1_ref, w2_ref, b2_ref, *rest,
    kernel_size, dilation, pad, core_len, p_drop, training, has_downsample,
):
    """One batch element per grid step.

    x_ref : (1, pad + core_len, Cpi)  causally left-zero-padded, channels-last
    w1_ref: (K, Cpi, Cpo)   w2_ref: (K, Cpo, Cpo)   b*_ref: (1, Cpo) f32
    wd_ref: (Cpi, Cpo), bd_ref: (1, Cpo)            (only if has_downsample)
    o_ref : (1, core_len, Cpo)
    h_pad : (pad + core_len, Cpo) VMEM scratch — conv1 activations, left-padded
    """
    if has_downsample:
        wd_ref, bd_ref, o_ref, h_pad = rest
    else:
        o_ref, h_pad = rest

    f32 = jnp.float32

    # ---- conv1: dilated causal conv as K shifted matmuls (MXU, f32 acc) ----
    h = None
    for k in range(kernel_size):
        xs = x_ref[0, pl.ds(k * dilation, core_len), :]
        t = jnp.dot(xs, w1_ref[k], preferred_element_type=f32)
        h = t if h is None else h + t
    h = jnp.maximum(h + b1_ref[...], 0.0)

    if training and p_drop > 0.0:
        h = _dropout(h, seed_ref[0] + 2 * pl.program_id(0), p_drop)

    # stage conv1 activations (left-padded with `pad` zero rows) in VMEM
    if pad > 0:
        h_pad[pl.ds(0, pad), :] = jnp.zeros((pad, h_pad.shape[1]), h_pad.dtype)
    h_pad[pl.ds(pad, core_len), :] = h.astype(h_pad.dtype)

    # ---- conv2 ----
    o = None
    for k in range(kernel_size):
        hs = h_pad[pl.ds(k * dilation, core_len), :]
        t = jnp.dot(hs, w2_ref[k], preferred_element_type=f32)
        o = t if o is None else o + t
    o = jnp.maximum(o + b2_ref[...], 0.0)

    if training and p_drop > 0.0:
        o = _dropout(o, seed_ref[0] + 2 * pl.program_id(0) + 1, p_drop)

    # ---- residual + final ReLU ----
    x_core = x_ref[0, pl.ds(pad, core_len), :]
    if has_downsample:
        res = jnp.dot(x_core, wd_ref[...], preferred_element_type=f32) + bd_ref[...]
    else:
        res = x_core.astype(f32)

    o_ref[0] = jnp.maximum(o + res, 0.0).astype(o_ref.dtype)


class TemporalBlock:
    """Pallas-TPU forward pass of the PyTorch TemporalBlock."""

    def __init__(self, n_inputs, n_outputs, kernel_size, stride, dilation,
                 padding, dropout=0.2, *, key=None, dtype=jnp.float32):
        if stride != 1:
            # TODO(synk): strided TCN conv not implemented (standard TCN uses stride=1).
            raise NotImplementedError("stride must be 1")
        if padding != (kernel_size - 1) * dilation:
            # The residual add in the reference module only shape-checks in this case.
            raise ValueError("padding must equal (kernel_size - 1) * dilation")

        self.n_inputs, self.n_outputs = n_inputs, n_outputs
        self.kernel_size, self.dilation, self.padding = kernel_size, dilation, padding
        self.p = float(dropout)
        self.has_downsample = n_inputs != n_outputs

        key = jax.random.PRNGKey(0) if key is None else key
        k1, k2, k3, kb1, kb2, kb3 = jax.random.split(key, 6)
        # weight_norm parameters: v ~ N(0, 0.01) (init_weights), g = ||v|| per
        # output channel (weight_norm init); biases ~ U(+-1/sqrt(fan_in)).
        self.w1_v = 0.01 * jax.random.normal(k1, (n_outputs, n_inputs, kernel_size), dtype)
        self.w1_g = jnp.sqrt(jnp.sum(self.w1_v.astype(jnp.float32) ** 2, axis=(1, 2))).astype(dtype)
        self.w2_v = 0.01 * jax.random.normal(k2, (n_outputs, n_outputs, kernel_size), dtype)
        self.w2_g = jnp.sqrt(jnp.sum(self.w2_v.astype(jnp.float32) ** 2, axis=(1, 2))).astype(dtype)
        b1_bound = 1.0 / math.sqrt(n_inputs * kernel_size)
        b2_bound = 1.0 / math.sqrt(n_outputs * kernel_size)
        self.b1 = jax.random.uniform(kb1, (n_outputs,), dtype, minval=-b1_bound, maxval=b1_bound)
        self.b2 = jax.random.uniform(kb2, (n_outputs,), dtype, minval=-b2_bound, maxval=b2_bound)
        if self.has_downsample:
            self.wd = 0.01 * jax.random.normal(k3, (n_outputs, n_inputs), dtype)
            bd_bound = 1.0 / math.sqrt(n_inputs)
            self.bd = jax.random.uniform(kb3, (n_outputs,), dtype, minval=-bd_bound, maxval=bd_bound)
        else:
            self.wd, self.bd = None, None

    def _effective_weights(self):
        # weight_norm forward: w = g * v / ||v|| (norm over all dims but dim 0)
        def wn(v, g):
            norm = jnp.sqrt(jnp.sum(v.astype(jnp.float32) ** 2, axis=(1, 2), keepdims=True))
            return (g[:, None, None].astype(jnp.float32) * v.astype(jnp.float32) / norm).astype(v.dtype)
        return wn(self.w1_v, self.w1_g), wn(self.w2_v, self.w2_g)

    def __call__(self, x, *, training=False, seed=0):
        # x: (B, C_in, L) — PyTorch Conv1d layout.
        B, Ci, L = x.shape
        assert Ci == self.n_inputs
        K, dil, P, Co = self.kernel_size, self.dilation, self.padding, self.n_outputs
        dtype = x.dtype

        w1, w2 = self._effective_weights()

        # TPU-friendly layout: channels-last, lanes padded to a multiple of 128,
        # time padded to a multiple of 8, causal left zero padding of size P.
        Cpi, Cpo, Lc = _round_up(Ci, 128), _round_up(Co, 128), _round_up(L, 8)

        xt = jnp.transpose(x, (0, 2, 1))                                   # (B, L, Ci)
        xp = jnp.zeros((B, P + Lc, Cpi), dtype).at[:, P:P + L, :Ci].set(xt)

        def pad_w(w):                                                      # (Co, Cin, K) -> (K, Cp_in, Cpo)
            cin = w.shape[1]
            wt = jnp.transpose(w, (2, 1, 0)).astype(dtype)                 # (K, Cin, Co)
            return jnp.zeros((K, _round_up(cin, 128), Cpo), dtype).at[:, :cin, :Co].set(wt)

        w1p = pad_w(w1)                                                    # (K, Cpi, Cpo)
        w2p = pad_w(w2)                                                    # (K, Cpo, Cpo)
        b1p = jnp.zeros((1, Cpo), jnp.float32).at[0, :Co].set(self.b1.astype(jnp.float32))
        b2p = jnp.zeros((1, Cpo), jnp.float32).at[0, :Co].set(self.b2.astype(jnp.float32))

        inputs = [xp, w1p, b1p, w2p, b2p]
        in_specs = [
            pl.BlockSpec((1, P + Lc, Cpi), lambda b, seed: (b, 0, 0)),     # x: one batch row per step
            pl.BlockSpec((K, Cpi, Cpo), lambda b, seed: (0, 0, 0)),        # conv1 weight (VMEM-resident)
            pl.BlockSpec((1, Cpo), lambda b, seed: (0, 0)),                # conv1 bias
            pl.BlockSpec((K, Cpo, Cpo), lambda b, seed: (0, 0, 0)),        # conv2 weight
            pl.BlockSpec((1, Cpo), lambda b, seed: (0, 0)),                # conv2 bias
        ]
        if self.has_downsample:
            wdp = jnp.zeros((Cpi, Cpo), dtype).at[:Ci, :Co].set(self.wd.T.astype(dtype))
            bdp = jnp.zeros((1, Cpo), jnp.float32).at[0, :Co].set(self.bd.astype(jnp.float32))
            inputs += [wdp, bdp]
            in_specs += [
                pl.BlockSpec((Cpi, Cpo), lambda b, seed: (0, 0)),
                pl.BlockSpec((1, Cpo), lambda b, seed: (0, 0)),
            ]

        kernel = functools.partial(
            _temporal_block_kernel,
            kernel_size=K, dilation=dil, pad=P, core_len=Lc,
            p_drop=self.p, training=bool(training),
            has_downsample=self.has_downsample,
        )

        out = pl.pallas_call(
            kernel,
            out_shape=jax.ShapeDtypeStruct((B, Lc, Cpo), dtype),
            grid_spec=pltpu.PrefetchScalarGridSpec(
                num_scalar_prefetch=1,                                     # dropout seed -> SMEM
                grid=(B,),
                in_specs=in_specs,
                out_specs=pl.BlockSpec((1, Lc, Cpo), lambda b, seed: (b, 0, 0)),
                scratch_shapes=[pltpu.VMEM((P + Lc, Cpo), dtype)],
            ),
            compiler_params=pltpu.CompilerParams(
                dimension_semantics=("parallel",),                         # batch tiles -> both TCs on v7x
            ),
        )(jnp.array([seed], jnp.int32), *inputs)

        # TODO(synk): very long sequences would additionally want time-tiling
        # with a 2*(K-1)*dilation halo; per-batch tiling bounds VMEM here.
        return jnp.transpose(out[:, :L, :Co], (0, 2, 1))                   # (B, C_out, L)

    # ---- pure-JAX (lax.conv) eval-mode reference, for correctness checks ----
    def reference(self, x):
        w1, w2 = self._effective_weights()
        P, dil = self.padding, self.dilation

        def conv(inp, w, b, dilation, padding):
            y = jax.lax.conv_general_dilated(
                inp.astype(jnp.float32), w.astype(jnp.float32),
                window_strides=(1,), padding=[(padding, padding)],
                rhs_dilation=(dilation,),
                dimension_numbers=("NCH", "OIH", "NCH"))
            return y + b.astype(jnp.float32)[None, :, None]

        def chomp(y, padding):
            return y[:, :, :y.shape[2] - padding] if padding > 0 else y

        h = jax.nn.relu(chomp(conv(x, w1, self.b1, dil, P), P))
        o = jax.nn.relu(chomp(conv(h, w2, self.b2, dil, P), P))
        if self.has_downsample:
            res = conv(x, self.wd[:, :, None], self.bd, 1, 0)
        else:
            res = x.astype(jnp.float32)
        return jax.nn.relu(o + res).astype(x.dtype)


if __name__ == "__main__":
    key = jax.random.PRNGKey(0)
    kx, kp = jax.random.split(key)

    B, C_in, C_out, L = 2, 4, 8, 16
    K, stride, dilation = 3, 1, 2
    padding = (K - 1) * dilation

    x = jax.random.normal(kx, (B, C_in, L), dtype=jnp.float32)
    block = TemporalBlock(C_in, C_out, K, stride, dilation, padding,
                          dropout=0.2, key=kp)

    # Eval-mode forward (dropout is identity) — checked against a lax.conv reference.
    y = block(x, training=False)
    jax.block_until_ready(y)
    assert y.shape == (B, C_out, L) and y.dtype == x.dtype
    ref = block.reference(x)
    assert jnp.allclose(y, ref, atol=1e-3, rtol=1e-3), "TemporalBlock mismatch vs reference"

    if jax.default_backend() == "tpu":
        # Training-mode dropout uses the TPU hardware PRNG (no CPU/interpret
        # lowering exists for prng_seed), so it is only exercised on real TPU.
        y_tr = block(x, training=True, seed=123)
        jax.block_until_ready(y_tr)
        assert y_tr.shape == (B, C_out, L)

    print("KERNEL_OK")
</pallas_src>

<mosaic_0001>
module attributes {stable_mosaic.version = 11 : i64} {
  func.func @_temporal_block_kernel(%arg0: i32, %arg1: memref<1xi32, #tpu.memory_space<smem>>, %arg2: memref<1x20x128xf32, #tpu.memory_space<vmem>>, %arg3: memref<3x128x128xf32, #tpu.memory_space<vmem>>, %arg4: memref<1x128xf32, #tpu.memory_space<vmem>>, %arg5: memref<3x128x128xf32, #tpu.memory_space<vmem>>, %arg6: memref<1x128xf32, #tpu.memory_space<vmem>>, %arg7: memref<128x128xf32, #tpu.memory_space<vmem>>, %arg8: memref<1x128xf32, #tpu.memory_space<vmem>>, %arg9: memref<1x16x128xf32, #tpu.memory_space<vmem>>, %arg10: memref<20x128xf32, #tpu.memory_space<vmem>>) attributes {dimension_semantics = [#tpu.dimension_semantics<parallel>], iteration_bounds = array<i64: 2>, scalar_prefetch = 1 : i64, scratch_operands = 1 : i64, tpu.core_type = #tpu.core_type<tc>, window_params = [{transform_indices = @transform_0, window_bounds = array<i64: 1, 20, 128>}, {pipeline_mode = #tpu.pipeline_mode<synchronous>, transform_indices = @transform_1, window_bounds = array<i64: 3, 128, 128>}, {pipeline_mode = #tpu.pipeline_mode<synchronous>, transform_indices = @transform_2, window_bounds = array<i64: 1, 128>}, {pipeline_mode = #tpu.pipeline_mode<synchronous>, transform_indices = @transform_3, window_bounds = array<i64: 3, 128, 128>}, {pipeline_mode = #tpu.pipeline_mode<synchronous>, transform_indices = @transform_4, window_bounds = array<i64: 1, 128>}, {pipeline_mode = #tpu.pipeline_mode<synchronous>, transform_indices = @transform_5, window_bounds = array<i64: 128, 128>}, {pipeline_mode = #tpu.pipeline_mode<synchronous>, transform_indices = @transform_6, window_bounds = array<i64: 1, 128>}, {transform_indices = @transform_7, window_bounds = array<i64: 1, 16, 128>}]} {
    %c0 = arith.constant 0 : index
    %c0_0 = arith.constant 0 : index
    %c0_1 = arith.constant 0 : index
    %0 = vector.load %arg2[%c0, %c0_0, %c0_1] : memref<1x20x128xf32, #tpu.memory_space<vmem>>, vector<1x16x128xf32>
    %1 = vector.shape_cast %0 : vector<1x16x128xf32> to vector<16x128xf32>
    %c0_2 = arith.constant 0 : index
    %c0_3 = arith.constant 0 : index
    %c0_4 = arith.constant 0 : index
    %2 = vector.load %arg3[%c0_2, %c0_3, %c0_4] : memref<3x128x128xf32, #tpu.memory_space<vmem>>, vector<1x128x128xf32>
    %3 = vector.shape_cast %2 : vector<1x128x128xf32> to vector<128x128xf32>
    %cst = arith.constant dense<0.000000e+00> : vector<16x128xf32>
    %4 = tpu.matmul %1, %3, %cst {dimension_numbers = #tpu.dot_dimension_numbers<[1], [0], [0], [1], [0, 0, 1, 1], [], []>} : vector<16x128xf32>, vector<128x128xf32>, vector<16x128xf32> -> vector<16x128xf32>
    %c0_5 = arith.constant 0 : index
    %c2 = arith.constant 2 : index
    %c0_6 = arith.constant 0 : index
    %5 = vector.load %arg2[%c0_5, %c2, %c0_6] : memref<1x20x128xf32, #tpu.memory_space<vmem>>, vector<1x16x128xf32>
    %6 = vector.shape_cast %5 : vector<1x16x128xf32> to vector<16x128xf32>
    %c1 = arith.constant 1 : index
    %c0_7 = arith.constant 0 : index
    %c0_8 = arith.constant 0 : index
    %7 = vector.load %arg3[%c1, %c0_7, %c0_8] : memref<3x128x128xf32, #tpu.memory_space<vmem>>, vector<1x128x128xf32>
    %8 = vector.shape_cast %7 : vector<1x128x128xf32> to vector<128x128xf32>
    %cst_9 = arith.constant dense<0.000000e+00> : vector<16x128xf32>
    %9 = tpu.matmul %6, %8, %cst_9 {dimension_numbers = #tpu.dot_dimension_numbers<[1], [0], [0], [1], [0, 0, 1, 1], [], []>} : vector<16x128xf32>, vector<128x128xf32>, vector<16x128xf32> -> vector<16x128xf32>
    %10 = arith.addf %4, %9 : vector<16x128xf32>
    %c0_10 = arith.constant 0 : index
    %c4 = arith.constant 4 : index
    %c0_11 = arith.constant 0 : index
    %11 = vector.load %arg2[%c0_10, %c4, %c0_11] : memref<1x20x128xf32, #tpu.memory_space<vmem>>, vector<1x16x128xf32>
    %12 = vector.shape_cast %11 : vector<1x16x128xf32> to vector<16x128xf32>
    %c2_12 = arith.constant 2 : index
    %c0_13 = arith.constant 0 : index
    %c0_14 = arith.constant 0 : index
    %13 = vector.load %arg3[%c2_12, %c0_13, %c0_14] : memref<3x128x128xf32, #tpu.memory_space<vmem>>, vector<1x128x128xf32>
    %14 = vector.shape_cast %13 : vector<1x128x128xf32> to vector<128x128xf32>
    %cst_15 = arith.constant dense<0.000000e+00> : vector<16x128xf32>
    %15 = tpu.matmul %12, %14, %cst_15 {dimension_numbers = #tpu.dot_dimension_numbers<[1], [0], [0], [1], [0, 0, 1, 1], [], []>} : vector<16x128xf32>, vector<128x128xf32>, vector<16x128xf32> -> vector<16x128xf32>
    %16 = arith.addf %10, %15 : vector<16x128xf32>
    %c0_16 = arith.constant 0 : index
    %c0_17 = arith.constant 0 : index
    %17 = vector.load %arg4[%c0_16, %c0_17] : memref<1x128xf32, #tpu.memory_space<vmem>>, vector<1x128xf32>
    %18 = vector.broadcast %17 : vector<1x128xf32> to vector<16x128xf32>
    %19 = arith.addf %16, %18 : vector<16x128xf32>
    %cst_18 = arith.constant 0.000000e+00 : f32
    %20 = vector.broadcast %cst_18 : f32 to vector<16x128xf32>
    %21 = arith.maximumf %19, %20 : vector<16x128xf32>
    %cst_19 = arith.constant 0.000000e+00 : f32
    %22 = vector.broadcast %cst_19 : f32 to vector<4x128xf32>
    %c0_20 = arith.constant 0 : index
    %c0_21 = arith.constant 0 : index
    %23 = vector.load %arg10[%c0_20, %c0_21] : memref<20x128xf32, #tpu.memory_space<vmem>>, vector<4x128xf32>
    tpu.vector_store %arg10[%c0_20, %c0_21], %22 {strides = array<i32>} : memref<20x128xf32, #tpu.memory_space<vmem>>, vector<4x128xf32>,
    %c4_22 = arith.constant 4 : index
    %c0_23 = arith.constant 0 : index
    %24 = vector.load %arg10[%c4_22, %c0_23] : memref<20x128xf32, #tpu.memory_space<vmem>>, vector<16x128xf32>
    tpu.vector_store %arg10[%c4_22, %c0_23], %21 {strides = array<i32>} : memref<20x128xf32, #tpu.memory_space<vmem>>, vector<16x128xf32>,
    %c0_24 = arith.constant 0 : index
    %c0_25 = arith.constant 0 : index
    %25 = vector.load %arg10[%c0_24, %c0_25] : memref<20x128xf32, #tpu.memory_space<vmem>>, vector<16x128xf32>
    %c0_26 = arith.constant 0 : index
    %c0_27 = arith.constant 0 : index
    %c0_28 = arith.constant 0 : index
    %26 = vector.load %arg5[%c0_26, %c0_27, %c0_28] : memref<3x128x128xf32, #tpu.memory_space<vmem>>, vector<1x128x128xf32>
    %27 = vector.shape_cast %26 : vector<1x128x128xf32> to vector<128x128xf32>
    %cst_29 = arith.constant dense<0.000000e+00> : vector<16x128xf32>
    %28 = tpu.matmul %25, %27, %cst_29 {dimension_numbers = #tpu.dot_dimension_numbers<[1], [0], [0], [1], [0, 0, 1, 1], [], []>} : vector<16x128xf32>, vector<128x128xf32>, vector<16x128xf32> -> vector<16x128xf32>
    %c2_30 = arith.constant 2 : index
    %c0_31 = arith.constant 0 : index
    %29 = vector.load %arg10[%c2_30, %c0_31] : memref<20x128xf32, #tpu.memory_space<vmem>>, vector<16x128xf32>
    %c1_32 = arith.constant 1 : index
    %c0_33 = arith.constant 0 : index
    %c0_34 = arith.constant 0 : index
    %30 = vector.load %arg5[%c1_32, %c0_33, %c0_34] : memref<3x128x128xf32, #tpu.memory_space<vmem>>, vector<1x128x128xf32>
    %31 = vector.shape_cast %30 : vector<1x128x128xf32> to vector<128x128xf32>
    %cst_35 = arith.constant dense<0.000000e+00> : vector<16x128xf32>
    %32 = tpu.matmul %29, %31, %cst_35 {dimension_numbers = #tpu.dot_dimension_numbers<[1], [0], [0], [1], [0, 0, 1, 1], [], []>} : vector<16x128xf32>, vector<128x128xf32>, vector<16x128xf32> -> vector<16x128xf32>
    %33 = arith.addf %28, %32 : vector<16x128xf32>
    %c4_36 = arith.constant 4 : index
    %c0_37 = arith.constant 0 : index
    %34 = vector.load %arg10[%c4_36, %c0_37] : memref<20x128xf32, #tpu.memory_space<vmem>>, vector<16x128xf32>
    %c2_38 = arith.constant 2 : index
    %c0_39 = arith.constant 0 : index
    %c0_40 = arith.constant 0 : index
    %35 = vector.load %arg5[%c2_38, %c0_39, %c0_40] : memref<3x128x128xf32, #tpu.memory_space<vmem>>, vector<1x128x128xf32>
    %36 = vector.shape_cast %35 : vector<1x128x128xf32> to vector<128x128xf32>
    %cst_41 = arith.constant dense<0.000000e+00> : vector<16x128xf32>
    %37 = tpu.matmul %34, %36, %cst_41 {dimension_numbers = #tpu.dot_dimension_numbers<[1], [0], [0], [1], [0, 0, 1, 1], [], []>} : vector<16x128xf32>, vector<128x128xf32>, vector<16x128xf32> -> vector<16x128xf32>
    %38 = arith.addf %33, %37 : vector<16x128xf32>
    %c0_42 = arith.constant 0 : index
    %c0_43 = arith.constant 0 : index
    %39 = vector.load %arg6[%c0_42, %c0_43] : memref<1x128xf32, #tpu.memory_space<vmem>>, vector<1x128xf32>
    %40 = vector.broadcast %39 : vector<1x128xf32> to vector<16x128xf32>
    %41 = arith.addf %38, %40 : vector<16x128xf32>
    %cst_44 = arith.constant 0.000000e+00 : f32
    %42 = vector.broadcast %cst_44 : f32 to vector<16x128xf32>
    %43 = arith.maximumf %41, %42 : vector<16x128xf32>
    %c0_45 = arith.constant 0 : index
    %c4_46 = arith.constant 4 : index
    %c0_47 = arith.constant 0 : index
    %44 = vector.load %arg2[%c0_45, %c4_46, %c0_47] : memref<1x20x128xf32, #tpu.memory_space<vmem>>, vector<1x16x128xf32>
    %45 = vector.shape_cast %44 : vector<1x16x128xf32> to vector<16x128xf32>
    %c0_48 = arith.constant 0 : index
    %c0_49 = arith.constant 0 : index
    %46 = vector.load %arg7[%c0_48, %c0_49] : memref<128x128xf32, #tpu.memory_space<vmem>>, vector<128x128xf32>
    %cst_50 = arith.constant dense<0.000000e+00> : vector<16x128xf32>
    %47 = tpu.matmul %45, %46, %cst_50 {dimension_numbers = #tpu.dot_dimension_numbers<[1], [0], [0], [1], [0, 0, 1, 1], [], []>} : vector<16x128xf32>, vector<128x128xf32>, vector<16x128xf32> -> vector<16x128xf32>
    %c0_51 = arith.constant 0 : index
    %c0_52 = arith.constant 0 : index
    %48 = vector.load %arg8[%c0_51, %c0_52] : memref<1x128xf32, #tpu.memory_space<vmem>>, vector<1x128xf32>
    %49 = vector.broadcast %48 : vector<1x128xf32> to vector<16x128xf32>
    %50 = arith.addf %47, %49 : vector<16x128xf32>
    %51 = arith.addf %43, %50 : vector<16x128xf32>
    %cst_53 = arith.constant 0.000000e+00 : f32
    %52 = vector.broadcast %cst_53 : f32 to vector<16x128xf32>
    %53 = arith.maximumf %51, %52 : vector<16x128xf32>
    %c0_54 = arith.constant 0 : index
    %c0_55 = arith.constant 0 : index
    %c0_56 = arith.constant 0 : index
    %54 = vector.load %arg9[%c0_54, %c0_55, %c0_56] : memref<1x16x128xf32, #tpu.memory_space<vmem>>, vector<1x16x128xf32>
    %55 = vector.shape_cast %54 : vector<1x16x128xf32> to vector<16x128xf32>
    %56 = vector.shape_cast %53 : vector<16x128xf32> to vector<1x16x128xf32>
    tpu.vector_store %arg9[%c0_54, %c0_55, %c0_56], %56 {strides = array<i32>} : memref<1x16x128xf32, #tpu.memory_space<vmem>>, vector<1x16x128xf32>,
    return
  }
  func.func @transform_0(%arg0: i32, %arg1: memref<1xi32, #tpu.memory_space<smem>>) -> (i32, i32, i32) {
    %c0_i32 = arith.constant 0 : i32
    %c0_i32_0 = arith.constant 0 : i32
    %c0_i32_1 = arith.constant 0 : i32
    return %arg0, %c0_i32, %c0_i32_0 : i32, i32, i32
  }
  func.func @transform_1(%arg0: i32, %arg1: memref<1xi32, #tpu.memory_space<smem>>) -> (i32, i32, i32) {
    %c0_i32 = arith.constant 0 : i32
    %c0_i32_0 = arith.constant 0 : i32
    %c0_i32_1 = arith.constant 0 : i32
    %c0_i32_2 = arith.constant 0 : i32
    return %c0_i32, %c0_i32_0, %c0_i32_1 : i32, i32, i32
  }
  func.func @transform_2(%arg0: i32, %arg1: memref<1xi32, #tpu.memory_space<smem>>) -> (i32, i32) {
    %c0_i32 = arith.constant 0 : i32
    %c0_i32_0 = arith.constant 0 : i32
    %c0_i32_1 = arith.constant 0 : i32
    return %c0_i32, %c0_i32_0 : i32, i32
  }
  func.func @transform_3(%arg0: i32, %arg1: memref<1xi32, #tpu.memory_space<smem>>) -> (i32, i32, i32) {
    %c0_i32 = arith.constant 0 : i32
    %c0_i32_0 = arith.constant 0 : i32
    %c0_i32_1 = arith.constant 0 : i32
    %c0_i32_2 = arith.constant 0 : i32
    return %c0_i32, %c0_i32_0, %c0_i32_1 : i32, i32, i32
  }
  func.func @transform_4(%arg0: i32, %arg1: memref<1xi32, #tpu.memory_space<smem>>) -> (i32, i32) {
    %c0_i32 = arith.constant 0 : i32
    %c0_i32_0 = arith.constant 0 : i32
    %c0_i32_1 = arith.constant 0 : i32
    return %c0_i32, %c0_i32_0 : i32, i32
  }
  func.func @transform_5(%arg0: i32, %arg1: memref<1xi32, #tpu.memory_space<smem>>) -> (i32, i32) {
    %c0_i32 = arith.constant 0 : i32
    %c0_i32_0 = arith.constant 0 : i32
    %c0_i32_1 = arith.constant 0 : i32
    return %c0_i32, %c0_i32_0 : i32, i32
  }
  func.func @transform_6(%arg0: i32, %arg1: memref<1xi32, #tpu.memory_space<smem>>) -> (i32, i32) {
    %c0_i32 = arith.constant 0 : i32
    %c0_i32_0 = arith.constant 0 : i32
    %c0_i32_1 = arith.constant 0 : i32
    return %c0_i32, %c0_i32_0 : i32, i32
  }
  func.func @transform_7(%arg0: i32, %arg1: memref<1xi32, #tpu.memory_space<smem>>) -> (i32, i32, i32) {
    %c0_i32 = arith.constant 0 : i32
    %c0_i32_0 = arith.constant 0 : i32
    %c0_i32_1 = arith.constant 0 : i32
    return %arg0, %c0_i32, %c0_i32_0 : i32, i32, i32
  }
}

</mosaic_0001>

<bundles_post_ra>
// kernel: tpu_custom_call.1
= control target key start
LH: loop header
LB: loop body
LE: loop exit
PB: predicated region body
PF: predicated region fallthrough
CT: control target
= control target key end

     0   :  { %14 = vsyncpa [#allocation6], 0  ;;  %s2277_s0 = inlined_call_operand.<no memory space> [shape: s32[1], index: 0, kind: input, shape index: {}]   ;;  %s2278_s1 = inlined_call_operand.vmem [shape: f32[2,20,128], index: 1, kind: input, shape index: {}]   ;;  %s2279_s2 = inlined_call_operand.hbm [shape: f32[3,128,128], index: 2, kind: input, shape index: {}]   ;;  %s2280_s3 = inlined_call_operand.vmem [shape: f32[1,128], index: 3, kind: input, shape index: {}]   ;;  %s2281_s4 = inlined_call_operand.hbm [shape: f32[3,128,128], index: 4, kind: input, shape index: {}]   ;;  %s2282_s5 = inlined_call_operand.vmem [shape: f32[1,128], index: 5, kind: input, shape index: {}]   ;;  %s2283_s6 = inlined_call_operand.hbm [shape: f32[128,128], index: 6, kind: input, shape index: {}]   ;;  %s2284_s7 = inlined_call_operand.vmem [shape: f32[1,128], index: 7, kind: input, shape index: {}]   ;;  %s2285_s8 = inlined_call_operand.hbm [shape: f32[2,16,128], index: 8, kind: output, shape index: {}]  }
   0x1   :  { %15 = vsyncpa [#allocation9], 0 }
   0x2   :  { %16 = vsyncpa [#allocation7], 0 }
   0x3   :  { %18 = vsyncpa [#allocation7 + $0x1], 0  ;;  %s2037_s26 = smov 0   ;;  %s2039_s27 = smov 0  }
   0x4   :  { %s2041_s28 = smov 0   ;;  %s2043_s29 = smov 0  }
   0x5 LB: > { %2292 = sst [smem:[#allocation15_spill]] %s1977_s28  ;;  %s2058_s30 = sadd.s32 4294967295, %s1981_s29   ;;  %s1981_s29 = sphi %s2043_s29, %s2307_s29   ;;  %s1977_s28 = sphi %s2041_s28, %s2309_s28   ;;  %s1973_s27 = sphi %s2039_s27, %s2311_s27   ;;  %s1969_s26 = sphi %s2037_s26, %s2310_s26  }
   0x6   : > { %s1127_s9 = sadd.s32 4294967294, %s1981_s29   ;;  %s2062_s10 = sadd.s32 1, %s1981_s29  }
   0x7   : > { %2293 = sst [smem:[#allocation16_spill]] %s2062_s10  ;;  %s183_s11 = sadd.s32 1, %s1977_s28 }
   0x8   : > { %s180_s12 = ssub.s32 %s1981_s29, %s2062_s10  ;;  %p193_p0 = scmp.ne.s32.totalorder %s1977_s28, %s1973_s27 }
   0x9   : > { %p181_p1 = scmp.eq.s32.totalorder %s180_s12, 0  ;;  %p194_p2 = scmp.eq.s32.totalorder %s2058_s30, 1 }
   0xa   : > { %p199_p3 = scmp.ne.s32.totalorder %s1973_s27, %s1969_s26  ;;  %p200_p4 = scmp.eq.s32.totalorder %s1127_s9, 1 }
   0xb   : > { %s2073_s13 = scalar_select %p181_p1, %s1977_s28, %s183_s11  }
   0xc   : > { %p2075_p5 = por %p194_p2, %p193_p0  ;;  %p2079_p6 = por %p200_p4, %p199_p3 }
   0xd   : > { %2294 = sst [smem:[#allocation17_spill]] %s2073_s13  ;;  %p1128_p7 = scmp.ge.s32.totalorder %s1981_s29, 1 }
   0xe   : > { %s2295_s14 = scalar_select %p2075_p5, 1, 0 }
   0xf   : > { %s2296_s15 = scalar_select %p2079_p6, 1, 0 }
  0x10   : > { %p207_p8 = scmp.lt.s32.totalorder %s1981_s29, 3  ;;  %p2286_p9 = scmp.eq.s32.totalorder %s2058_s30, 0 }
  0x11   : > { %s1983_s17 = smov [#allocation8]   ;;  %s1984_s20 = smov [#allocation5]  }
  0x12   : > { %p2086_p10 = pnand %p1128_p7, %p207_p8  ;;  %s235_s18 = sshll.u32 %s1983_s17, 4  ;;  %s2092_s18 = int_to_ptr.vmem [resolvable:$true] %s235_s18 }
  0x13   : > { %s219_s21 = sshll.u32 %s1984_s20, 4  ;;  %s1985_s22 = smov [#allocation10]   ;;  %s2100_s21 = int_to_ptr.vmem [resolvable:$true] %s219_s21 }
  0x14   : > { %s2297_s16 = scalar_select %p2086_p10, 1, 0 }
  0x15   : > { %p1766_p11 = pneg %p2086_p10  ;;  %s2102_s23 = sshll.u32 %s1985_s22, 4  ;;  %s252_s23 = int_to_ptr.vmem [resolvable:$true] %s2102_s23 }
  0x16   : > { %s1827_s25 = scalar_lea.hbm %s2281_s4, 6144 }
  0x17   : > { %p2096_p12 = pnand %p2286_p9, %p1766_p11  ;;  %p1828_p13 = scmp.ne.s32.totalorder %s2281_s4, %s1827_s25 }
  0x18   : > { %p1834_p3 = scmp.lt.u32.totalorder %s1827_s25, %s2281_s4 }
  0x19   : > { %p2112_p0 = pneg %p2096_p12 }
  0x1b   : > { %p1830_p1 = pnand %p2112_p0, %p1828_p13 }
  0x1d   : > { %p1831_p2 = pneg %p1830_p1 }
  0x1f   : > { %p1836_p4 = pnand %p1834_p3, %p1831_p2 }
  0x21   : > { %1839 = shalt.err (!%p1836_p4)
}
  0x22   : > { %s1840_s22 = scalar_lea.vmem %s2092_s18, 6144  ;;  %p1848_p9 = scmp.lt.s32.totalorder %s2092_s18, %s2092_s18 }
  0x23   : > { %p1841_p7 = scmp.ne.s32.totalorder %s2092_s18, %s1840_s22  ;;  %p1849_p6 = scmp.lt.s32.totalorder %s1840_s22, %s1840_s22 }
  0x25   : > { %p1843_p8 = pnand %p1841_p7, %p2112_p0  ;;  %p1850_p13 = por %p1849_p6, %p1848_p9 }
  0x27   : > { %p1844_p11 = pneg %p1843_p8 }
  0x29   : > { %p1851_p1 = pnand %p1850_p13, %p1844_p11 }
  0x2b   : > { %1854 = shalt.err (!%p1851_p1)
}
  0x2c   : > { %s1986_s0 = smov 128   ;;  %s1987_s24 = smov 8  }
  0x2d   : > { %1772 = dma.hbm_to_vmem [thread:$0]  (!%p2096_p12), %s2281_s4, 6144, %s2092_s18, [#allocation9], %s1986_s0, %s1986_s0, %s1987_s24  }
  0x2e   : > { %s1855_s20 = scalar_lea.hbm %s2279_s2, 6144 }
  0x2f   : > { %p1856_p6 = scmp.ne.s32.totalorder %s2279_s2, %s1855_s20  ;;  %p1862_p3 = scmp.lt.u32.totalorder %s1855_s20, %s2279_s2 }
  0x31   : > { %p1858_p9 = pnand %p1856_p6, %p2112_p0 }
  0x33   : > { %p1859_p2 = pneg %p1858_p9 }
  0x35   : > { %p1864_p4 = pnand %p1862_p3, %p1859_p2 }
  0x37   : > { %1867 = shalt.err (!%p1864_p4)
}
  0x38   : > { %s1868_s18 = scalar_lea.vmem %s2100_s21, 6144  ;;  %p1876_p13 = scmp.lt.s32.totalorder %s2100_s21, %s2100_s21 }
  0x39   : > { %p1869_p7 = scmp.ne.s32.totalorder %s2100_s21, %s1868_s18  ;;  %p1877_p1 = scmp.lt.s32.totalorder %s1868_s18, %s1868_s18 }
  0x3b   : > { %p1871_p8 = pnand %p1869_p7, %p2112_p0  ;;  %p1878_p6 = por %p1877_p1, %p1876_p13 }
  0x3d   : > { %p1872_p11 = pneg %p1871_p8 }
  0x3f   : > { %p1879_p9 = pnand %p1878_p6, %p1872_p11 }
  0x41   : > { %1882 = shalt.err (!%p1879_p9)
}
  0x42   : > { %1769 = dma.hbm_to_vmem [thread:$0]  (!%p2096_p12), %s2279_s2, 6144, %s2100_s21, [#allocation6], %s1986_s0, %s1986_s0, %s1987_s24  }
  0x43   : > { %s1883_s9 = scalar_lea.hbm %s2283_s6, 2048 }
  0x44   : > { %p1884_p2 = scmp.ne.s32.totalorder %s2283_s6, %s1883_s9  ;;  %p1890_p7 = scmp.lt.u32.totalorder %s1883_s9, %s2283_s6 }
  0x46   : > { %p1886_p3 = pnand %p1884_p2, %p2112_p0 }
  0x48   : > { %p1887_p4 = pneg %p1886_p3 }
  0x4a   : > { %p1892_p8 = pnand %p1890_p7, %p1887_p4 }
  0x4c   : > { %1895 = shalt.err (!%p1892_p8)
}
  0x4d   : > { %s1896_s18 = scalar_lea.vmem %s252_s23, 2048  ;;  %p1904_p6 = scmp.lt.s32.totalorder %s252_s23, %s252_s23 }
  0x4e   : > { %p1897_p11 = scmp.ne.s32.totalorder %s252_s23, %s1896_s18  ;;  %p1905_p9 = scmp.lt.s32.totalorder %s1896_s18, %s1896_s18 }
  0x50   : > { %p1899_p13 = pnand %p1897_p11, %p2112_p0  ;;  %p1906_p5 = por %p1905_p9, %p1904_p6 }
  0x52   : > { %p1900_p1 = pneg %p1899_p13 }
  0x54   : > { %p1907_p10 = pnand %p1906_p5, %p1900_p1 }
  0x56   : > { %1910 = shalt.err (!%p1907_p10)
}
  0x57   : > { %1775 = dma.hbm_to_vmem [thread:$0]  (!%p2096_p12), %s2283_s6, 2048, %s252_s23, [#allocation9], %s1986_s0, %s1986_s0, %s1987_s24  }
  0x58   : > { %p2300_p2 = scmp.ne.s32.totalorder %s2297_s16, 0 }
  0x59   : > { %p2301_p0 = scmp.eq.s32.totalorder (!%p2300_p2), %s2058_s30, 0 }
  0x5a   : > { %278 = sbr.rel (%p2300_p2) target bundleno = 726 (0x2d6), region = 48 }
  0x61   : > { %1956 = dma.done.wait (%p2301_p0), [#allocation6], 6144   ;;  %p2302_p3 = pmov %p2301_p0 }
  0x62   : > { %p2303_p5 = pmov %p2301_p0 }
  0x63   : > { %1958 = vsyncadd (%p2302_p3), [#allocation6], 4294961152 }
  0x64   : > { %1960 = dma.done.wait (%p2303_p5), [#allocation9], 8192   ;;  %p2304_p10 = pmov %p2301_p0 }
  0x65   : > { %p318_p4 = scmp.lt.s32.totalorder %s2058_s30, 1  ;;  %v344_v0 = vld [vmem:[#allocation5 + $0x80] sm:$0xff]  ;;  %v345_v1 = vld [vmem:[#allocation5 + $0x88] sm:$0xff]  ;;  %v346_v2 = vld [vmem:[#allocation5 + $0x90] sm:$0xff]  ;;  %s315_s13 = sand.u32 1, %s1973_s27  }
  0x66   : > { %1962 = vsyncadd (%p2304_p10), [#allocation9], 4294959104  ;;  %v1519_v3 = vpack.c.bf16 %v345_v1, %v344_v0  ;;  %v347_v4 = vld [vmem:[#allocation5 + $0x98] sm:$0xff]  ;;  %v348_v6 = vld [vmem:[#allocation5 + $0xa0] sm:$0xff]  ;;  %s1137_s11 = sshll.u32 %s315_s13, 4  ;;  %s1147_s21 = sshll.u32 %s2058_s30, 8 }
  0x67   : > { %s319_s19 = scalar_select %p318_p4, %s2058_s30, 1  ;;  %v1523_v5 = vpack.c.bf16 %v347_v4, %v346_v2  ;;  %v349_v7 = vld [vmem:[#allocation5 + $0xa8] sm:$0xff]  ;;  %v350_v10 = vld [vmem:[#allocation5 + $0xb0] sm:$0xff]  ;;  %v351_v11 = vld [vmem:[#allocation5 + $0xb8] sm:$0xff] }
  0x68   : > { %1520 = vmatprep.subr.bf16.mxu0 %v1519_v3  ;;  %v1527_v8 = vpack.c.bf16 %v349_v7, %v348_v6  ;;  %v1531_v12 = vpack.c.bf16 %v351_v11, %v350_v10  ;;  %v352_v13 = vld [vmem:[#allocation5 + $0xc0] sm:$0xff]  ;;  %v353_v14 = vld [vmem:[#allocation5 + $0xc8] sm:$0xff]  ;;  %v354_v16 = vld [vmem:[#allocation5 + $0xd0] sm:$0xff]  ;;  %s317_s22 = scalar_lea.vmem [#allocation11], %s1137_s11  ;;  %s2236_s16 = scalar_lea.sflag [#allocation7], %s315_s13 }
  0x69   : > { %s1751_s23 = smul.u32 24, %s319_s19  ;;  %1522 = vmatpush3.bf16.msra.mxu0 %v1519_v3  ;;  %v1535_v15 = vpack.c.bf16 %v353_v14, %v352_v13  ;;  %v355_v17 = vld [vmem:[#allocation5 + $0xd8] sm:$0xff]  ;;  %v356_v19 = vld [vmem:[#allocation5 + $0xe0] sm:$0xff]  ;;  %v357_v20 = vld [vmem:[#allocation5 + $0xe8] sm:$0xff]  ;;  %s1034_s18 = sshll.u32 %s317_s22, 4  ;;  %s2229_s18 = int_to_ptr.vmem [resolvable:$true] %s1034_s18 }
  0x6a   : > { %1524 = vmatprep.subr.bf16.mxu0 %v1523_v5  ;;  %v1539_v18 = vpack.c.bf16 %v355_v17, %v354_v16  ;;  %v641_v21 = vld [vmem:[#allocation8 + $0x80] sm:$0xff]  ;;  %v642_v22 = vld [vmem:[#allocation8 + $0x88] sm:$0xff]  ;;  %v643_v23 = vld [vmem:[#allocation8 + $0x90] sm:$0xff]  ;;  %v1543_v29 = vpack.c.bf16 %v357_v20, %v356_v19  ;;  %s1911_s12 = scalar_lea.vmem %s2229_s18, 256  ;;  %p2305_p7 = scmp.ne.s32.totalorder %s2295_s14, 0 }
  0x6b   : > { %s2199_s0 = scalar_lea.vmem %s2278_s1, %s1751_s23  ;;  %v1615_v24 = vpack.c.bf16 %v642_v22, %v641_v21  ;;  %v644_v25 = vld [vmem:[#allocation8 + $0x98] sm:$0xff]  ;;  %v645_v27 = vld [vmem:[#allocation8 + $0xa0] sm:$0xff]  ;;  %v646_v28 = vld [vmem:[#allocation8 + $0xa8] sm:$0xff]  ;;  %s2234_s23 = scalar_lea.hbm %s2285_s8, %s1147_s21 }
  0x6c   : > { %v341_v9 = vld [vmem:[%s2199_s0 + $0x2] sm:$0xff]  ;;  %v1619_v26 = vpack.c.bf16 %v644_v25, %v643_v23  ;;  %v359_v31 = vld [vmem:[#allocation5 + $0xf8] sm:$0xff]  ;;  %v1623_v32 = vpack.c.bf16 %v646_v28, %v645_v27  ;;  %v325_v36 = vld [vmem:[#allocation5] sm:$0xff]  ;;  %p1912_p12 = scmp.ne.s32.totalorder %s2229_s18, %s1911_s12  ;;  %s1989_s30 = smov [#allocation11]  }
  0x6d   : > { %1306 = vmatprep.mubr.f32.mxu0 %v341_v9  ;;  %1526 = vmatpush3.bf16.msra.mxu0 %v1523_v5  ;;  %v358_v30 = vld [vmem:[#allocation5 + $0xf0] sm:$0xff]  ;;  %v648_v34 = vld [vmem:[#allocation8 + $0xb8] sm:$0xff]  ;;  %v326_v37 = vld [vmem:[#allocation5 + $0x8] sm:$0xff] }
  0x6e   : > { %1528 = vmatprep.subr.bf16.mxu0 %v1527_v8  ;;  %1616 = vmatprep.subr.bf16.mxu1 %v1615_v24  ;;  %v647_v33 = vld [vmem:[#allocation8 + $0xb0] sm:$0xff]  ;;  %v1547_v35 = vpack.c.bf16 %v359_v31, %v358_v30  ;;  %v649_v39 = vld [vmem:[#allocation8 + $0xc0] sm:$0xff]  ;;  %v650_v40 = vld [vmem:[#allocation8 + $0xc8] sm:$0xff]  ;;  %v1551_v41 = vpack.c.bf16 %v326_v37, %v325_v36  ;;  %v1988_v37 = vmov 0.0   ;;  %p1913_p8 = pnand %p1912_p12, %p2305_p7 }
  0x6f   : > { %1618 = vmatpush3.bf16.msra.mxu1 %v1615_v24  ;;  %v1627_v38 = vpack.c.bf16 %v648_v34, %v647_v33  ;;  %v327_v42 = vld [vmem:[#allocation5 + $0x10] sm:$0xff]  ;;  %v328_v43 = vld [vmem:[#allocation5 + $0x18] sm:$0xff]  ;;  %v1631_v44 = vpack.c.bf16 %v650_v40, %v649_v39  ;;  %v323_v47 = vld [vmem:[%s2199_s0] sm:$0xff]  ;;  %617 = vst [vmem:[#allocation2] sm:$0xf] %v1988_v37 }
  0x70   : > { %1620 = vmatprep.subr.bf16.mxu1 %v1619_v26  ;;  %v342_v45 = vld [vmem:[%s2199_s0 + $0xa] sm:$0xff]  ;;  %v1555_v46 = vpack.c.bf16 %v328_v43, %v327_v42  ;;  %v329_v48 = vld [vmem:[#allocation5 + $0x20] sm:$0xff]  ;;  %v330_v49 = vld [vmem:[#allocation5 + $0x28] sm:$0xff]  ;;  %p1914_p11 = pneg %p1913_p8 }
  0x71   : > { %1530 = vmatpush3.bf16.msra.mxu0 %v1527_v8  ;;  %v1559_v50 = vpack.c.bf16 %v330_v49, %v329_v48  ;;  %v331_v51 = vld [vmem:[#allocation5 + $0x30] sm:$0xff]  ;;  %v332_v52 = vld [vmem:[#allocation5 + $0x38] sm:$0xff]  ;;  %v333_v54 = vld [vmem:[#allocation5 + $0x40] sm:$0xff] }
  0x72   : > { %1532 = vmatprep.subr.bf16.mxu0 %v1531_v12  ;;  %v1563_v53 = vpack.c.bf16 %v332_v52, %v331_v51  ;;  %v334_v55 = vld [vmem:[#allocation5 + $0x48] sm:$0xff]  ;;  %v335_v57 = vld [vmem:[#allocation5 + $0x50] sm:$0xff]  ;;  %v336_v58 = vld [vmem:[#allocation5 + $0x58] sm:$0xff] }
  0x73   : > { %1622 = vmatpush3.bf16.msra.mxu1 %v1619_v26  ;;  %v1567_v56 = vpack.c.bf16 %v334_v55, %v333_v54  ;;  %v1571_v59 = vpack.c.bf16 %v336_v58, %v335_v57  ;;  %v337_v60 = vld [vmem:[#allocation5 + $0x60] sm:$0xff]  ;;  %v338_v61 = vld [vmem:[#allocation5 + $0x68] sm:$0xff]  ;;  %v339_v63 = vld [vmem:[#allocation5 + $0x70] sm:$0xff] }
  0x74   : > { %1624 = vmatprep.subr.bf16.mxu1 %v1623_v32  ;;  %v1575_v62 = vpack.c.bf16 %v338_v61, %v337_v60  ;;  %v340_v0 = vld [vmem:[#allocation5 + $0x78] sm:$0xff]  ;;  %v513_v2 = vld [vmem:[#allocation5 + $0x100] sm:$0xff]  ;;  %v514_v3 = vld [vmem:[#allocation5 + $0x108] sm:$0xff] }
  0x75   : > { %1534 = vmatpush3.bf16.msra.mxu0 %v1531_v12  ;;  %v1579_v1 = vpack.c.bf16 %v340_v0, %v339_v63  ;;  %v1583_v4 = vpack.c.bf16 %v514_v3, %v513_v2  ;;  %v515_v5 = vld [vmem:[#allocation5 + $0x110] sm:$0xff]  ;;  %v516_v6 = vld [vmem:[#allocation5 + $0x118] sm:$0xff]  ;;  %v517_v10 = vld [vmem:[#allocation5 + $0x120] sm:$0xff] }
  0x76   : > { %1536 = vmatprep.subr.bf16.mxu0 %v1535_v15  ;;  %v324_v7 = vld [vmem:[%s2199_s0 + $0x8] sm:$0xff]  ;;  %v1587_v8 = vpack.c.bf16 %v516_v6, %v515_v5  ;;  %v518_v11 = vld [vmem:[#allocation5 + $0x128] sm:$0xff]  ;;  %v520_v14 = vld [vmem:[#allocation5 + $0x138] sm:$0xff] }
  0x77   : > { %1626 = vmatpush3.bf16.msra.mxu1 %v1623_v32  ;;  %v510_v9 = vld [vmem:[%s2199_s0 + $0x4] sm:$0xff]  ;;  %v1591_v12 = vpack.c.bf16 %v518_v11, %v517_v10  ;;  %v521_v16 = vld [vmem:[#allocation5 + $0x140] sm:$0xff]  ;;  %v524_v20 = vld [vmem:[#allocation5 + $0x158] sm:$0xff] }
  0x78   : > { %1628 = vmatprep.subr.bf16.mxu1 %v1627_v38  ;;  %v519_v13 = vld [vmem:[#allocation5 + $0x130] sm:$0xff]  ;;  %v522_v17 = vld [vmem:[#allocation5 + $0x148] sm:$0xff]  ;;  %v525_v22 = vld [vmem:[#allocation5 + $0x160] sm:$0xff] }
  0x79   : > { %1538 = vmatpush3.bf16.msra.mxu0 %v1535_v15  ;;  %v1595_v15 = vpack.c.bf16 %v520_v14, %v519_v13  ;;  %v523_v19 = vld [vmem:[#allocation5 + $0x150] sm:$0xff]  ;;  %v526_v23 = vld [vmem:[#allocation5 + $0x168] sm:$0xff]  ;;  %v528_v26 = vld [vmem:[#allocation5 + $0x178] sm:$0xff] }
  0x7a   : > { %1540 = vmatprep.subr.bf16.mxu0 %v1539_v18  ;;  %v1603_v21 = vpack.c.bf16 %v524_v20, %v523_v19  ;;  %v1607_v24 = vpack.c.bf16 %v526_v23, %v525_v22  ;;  %v527_v25 = vld [vmem:[#allocation5 + $0x170] sm:$0xff]  ;;  %v652_v30 = vld [vmem:[#allocation8 + $0xd8] sm:$0xff]  ;;  %v653_v32 = vld [vmem:[#allocation8 + $0xe0] sm:$0xff] }
  0x7b   : > { %1630 = vmatpush3.bf16.msra.mxu1 %v1627_v38  ;;  %v1611_v27 = vpack.c.bf16 %v528_v26, %v527_v25  ;;  %v2207_v28 = vld [vmem:[%s2199_s0 + $0xc] sm:$0xff]  ;;  %v654_v33 = vld [vmem:[#allocation8 + $0xe8] sm:$0xff]  ;;  %v622_v39 = vld [vmem:[#allocation8] sm:$0xff]  ;;  %s1915_s0 = sshll.u32 %s1989_s30, 4  ;;  %s1916_s0 = int_to_ptr.vmem [resolvable:$false] %s1915_s0 }
  0x7c   : > { %1632 = vmatprep.subr.bf16.mxu1 %v1631_v44  ;;  %v1639_v34 = vpack.c.bf16 %v654_v33, %v653_v32  ;;  %v656_v36 = vld [vmem:[#allocation8 + $0xf8] sm:$0xff]  ;;  %v623_v40 = vld [vmem:[#allocation8 + $0x8] sm:$0xff]  ;;  %v916_v42 = vld [vmem:[#allocation10] sm:$0xff]  ;;  %s1917_s24 = scalar_lea.vmem %s1916_s0, 512  ;;  %p1918_p13 = scmp.lt.s32.totalorder %s2229_s18, %s1916_s0 }
  0x7d   : > { %1542 = vmatpush3.bf16.msra.mxu0 %v1539_v18  ;;  %v1599_v18 = vpack.c.bf16 %v522_v17, %v521_v16  ;;  %v917_v43 = vld [vmem:[#allocation10 + $0x8] sm:$0xff]  ;;  %v920_v48 = vld [vmem:[#allocation10 + $0x20] sm:$0xff]  ;;  %v922_v51 = vld [vmem:[#allocation10 + $0x30] sm:$0xff]  ;;  %p1919_p1 = scmp.lt.s32.totalorder %s1917_s24, %s1911_s12 }
  0x7e   : > { %1544 = vmatprep.subr.bf16.mxu0 %v1543_v29  ;;  %v921_v49 = vld [vmem:[#allocation10 + $0x28] sm:$0xff]  ;;  %v923_v52 = vld [vmem:[#allocation10 + $0x38] sm:$0xff]  ;;  %v924_v54 = vld [vmem:[#allocation10 + $0x40] sm:$0xff] }
  0x7f   : > { %1634 = vmatpush3.bf16.msra.mxu1 %v1631_v44  ;;  %v1711_v44 = vpack.c.bf16 %v917_v43, %v916_v42  ;;  %v925_v55 = vld [vmem:[#allocation10 + $0x48] sm:$0xff]  ;;  %v926_v57 = vld [vmem:[#allocation10 + $0x50] sm:$0xff]  ;;  %v927_v58 = vld [vmem:[#allocation10 + $0x58] sm:$0xff]  ;;  %p1920_p6 = por %p1919_p1, %p1918_p13 }
  0x80   : > { %v928_v60 = vld [vmem:[#allocation10 + $0x60] sm:$0xff]  ;;  %v929_v61 = vld [vmem:[#allocation10 + $0x68] sm:$0xff]  ;;  %v930_v63 = vld [vmem:[#allocation10 + $0x70] sm:$0xff] }
  0x81   : > { %1546 = vmatpush3.bf16.msra.mxu0 %v1543_v29  ;;  %v651_v29 = vld [vmem:[#allocation8 + $0xd0] sm:$0xff]  ;;  %v931_v0 = vld [vmem:[#allocation10 + $0x78] sm:$0xff]  ;;  %v1139_v2 = vld [vmem:[%s2280_s3] ss:$0 sm:$0xff]  ;;  %p1921_p9 = pnand %p1920_p6, %p1914_p11 }
  0x82   : > { %1548 = vmatprep.subr.bf16.mxu0 %v1547_v35  ;;  %v1635_v31 = vpack.c.bf16 %v652_v30, %v651_v29  ;;  %v625_v10 = vld [vmem:[#allocation8 + $0x18] sm:$0xff]  ;;  %v626_v14 = vld [vmem:[#allocation8 + $0x20] sm:$0xff]  ;;  %v631_v22 = vld [vmem:[#allocation8 + $0x48] sm:$0xff] }
  0x83   : > { %v629_v19 = vld [vmem:[#allocation8 + $0x38] sm:$0xff]  ;;  %v636_v30 = vld [vmem:[#allocation8 + $0x70] sm:$0xff]  ;;  %v810_v33 = vld [vmem:[#allocation8 + $0x100] sm:$0xff] }
  0x84   : > { %1636 = vmatprep.subr.bf16.mxu1 %v1635_v31  ;;  %v633_v25 = vld [vmem:[#allocation8 + $0x58] sm:$0xff]  ;;  %v816_v43 = vld [vmem:[#allocation8 + $0x130] sm:$0xff] }
  0x85   : > { %1550 = vmatpush3.bf16.msra.mxu0 %v1547_v35  ;;  %1638 = vmatpush3.bf16.msra.mxu1 %v1635_v31  ;;  %v655_v35 = vld [vmem:[#allocation8 + $0xf0] sm:$0xff]  ;;  %v637_v31 = vld [vmem:[#allocation8 + $0x78] sm:$0xff] }
  0x86   : > { %1552 = vmatprep.subr.bf16.mxu0 %v1551_v41  ;;  %1640 = vmatprep.subr.bf16.mxu1 %v1639_v34  ;;  %v1643_v38 = vpack.c.bf16 %v656_v36, %v655_v35  ;;  %v1675_v32 = vpack.c.bf16 %v637_v31, %v636_v30  ;;  %v812_v36 = vld [vmem:[#allocation8 + $0x110] sm:$0xff]  ;;  %v813_v37 = vld [vmem:[#allocation8 + $0x118] sm:$0xff] }
  0x88   : > { %1307 = vmatmul.mubr.f32.vlgmr.msra.gmra.mrb[0].mxu0 %v342_v45  ;;  %v918_v45 = vld [vmem:[#allocation10 + $0x10] sm:$0xff] }
  0x89   : > { %1554 = vmatpush3.bf16.msra.mxu0 %v1551_v41  ;;  %1341 = vmatprep.mubr.f32.mxu0 %v323_v47  ;;  %v1647_v41 = vpack.c.bf16 %v623_v40, %v622_v39  ;;  %v814_v40 = vld [vmem:[#allocation8 + $0x120] sm:$0xff] }
  0x8a   : > { %1556 = vmatprep.subr.bf16.mxu0 %v1555_v46  ;;  %1642 = vmatpush3.bf16.msra.mxu1 %v1639_v34  ;;  %v811_v34 = vld [vmem:[#allocation8 + $0x108] sm:$0xff] }
  0x8b   : > { %1644 = vmatprep.subr.bf16.mxu1 %v1643_v38  ;;  %v1679_v35 = vpack.c.bf16 %v811_v34, %v810_v33 }
  0x8d   : > { %1558 = vmatpush3.bf16.msra.mxu0 %v1555_v46  ;;  %v919_v46 = vld [vmem:[#allocation10 + $0x18] sm:$0xff] }
  0x8e   : > { %1560 = vmatprep.subr.bf16.mxu0 %v1559_v50  ;;  %1646 = vmatpush3.bf16.msra.mxu1 %v1643_v38  ;;  %v1715_v47 = vpack.c.bf16 %v919_v46, %v918_v45  ;;  %v1683_v38 = vpack.c.bf16 %v813_v37, %v812_v36  ;;  %v818_v46 = vld [vmem:[#allocation8 + $0x140] sm:$0xff] }
  0x8f   : > { %1648 = vmatprep.subr.bf16.mxu1 %v1647_v41 }
  0x91   : > { %1562 = vmatpush3.bf16.msra.mxu0 %v1559_v50  ;;  %v1719_v50 = vpack.c.bf16 %v921_v49, %v920_v48  ;;  %v820_v49 = vld [vmem:[#allocation8 + $0x150] sm:$0xff] }
  0x92   : > { %1564 = vmatprep.subr.bf16.mxu0 %v1563_v53 }
  0x95   : > { %1566 = vmatpush3.bf16.msra.mxu0 %v1563_v53  ;;  %v1723_v53 = vpack.c.bf16 %v923_v52, %v922_v51  ;;  %v822_v52 = vld [vmem:[#allocation8 + $0x160] sm:$0xff] }
  0x96   : > { %1568 = vmatprep.subr.bf16.mxu0 %v1567_v56 }
  0x99   : > { %1570 = vmatpush3.bf16.msra.mxu0 %v1567_v56  ;;  %v1727_v56 = vpack.c.bf16 %v925_v55, %v924_v54  ;;  %v824_v55 = vld [vmem:[#allocation8 + $0x170] sm:$0xff] }
  0x9a   : > { %1572 = vmatprep.subr.bf16.mxu0 %v1571_v59 }
  0x9d   : > { %1574 = vmatpush3.bf16.msra.mxu0 %v1571_v59  ;;  %v1731_v59 = vpack.c.bf16 %v927_v58, %v926_v57 }
  0x9e   : > { %1576 = vmatprep.subr.bf16.mxu0 %v1575_v62 }
  0xa1   : > { %1578 = vmatpush3.bf16.msra.mxu0 %v1575_v62  ;;  %v1735_v62 = vpack.c.bf16 %v929_v61, %v928_v60  ;;  %v1140_v60 = vld [vmem:[%s2282_s5] ss:$0 sm:$0xff] }
  0xa2   : > { %1580 = vmatprep.subr.bf16.mxu0 %v1579_v1  ;;  %v1141_v61 = vld [vmem:[%s2284_s7] ss:$0 sm:$0xff] }
  0xa5   : > { %1582 = vmatpush3.bf16.msra.mxu0 %v1579_v1  ;;  %v1739_v1 = vpack.c.bf16 %v931_v0, %v930_v63 }
  0xa6   : > { %1584 = vmatprep.subr.bf16.mxu0 %v1583_v4 }
  0xa8   : > { %1342 = vmatmul.mubr.f32.vlgmr.msra.gmra.mrb[0].mxu0 %v324_v7 }
  0xa9   : > { %1586 = vmatpush3.bf16.msra.mxu0 %v1583_v4  ;;  %1376 = vmatprep.mubr.f32.mxu0 %v510_v9 }
  0xaa   : > { %1588 = vmatprep.subr.bf16.mxu0 %v1587_v8 }
  0xad   : > { %1590 = vmatpush3.bf16.msra.mxu0 %v1587_v8 }
  0xae   : > { %1592 = vmatprep.subr.bf16.mxu0 %v1591_v12 }
  0xb1   : > { %1594 = vmatpush3.bf16.msra.mxu0 %v1591_v12 }
  0xb2   : > { %1596 = vmatprep.subr.bf16.mxu0 %v1595_v15 }
  0xb5   : > { %1598 = vmatpush3.bf16.msra.mxu0 %v1595_v15  ;;  %v627_v15 = vld [vmem:[#allocation8 + $0x28] sm:$0xff] }
  0xb6   : > { %1600 = vmatprep.subr.bf16.mxu0 %v1599_v18  ;;  %v1655_v17 = vpack.c.bf16 %v627_v15, %v626_v14 }
  0xb9   : > { %1602 = vmatpush3.bf16.msra.mxu0 %v1599_v18  ;;  %v628_v18 = vld [vmem:[#allocation8 + $0x30] sm:$0xff] }
  0xba   : > { %1604 = vmatprep.subr.bf16.mxu0 %v1603_v21  ;;  %v1659_v20 = vpack.c.bf16 %v629_v19, %v628_v18 }
  0xbd   : > { %1606 = vmatpush3.bf16.msra.mxu0 %v1603_v21  ;;  %v630_v21 = vld [vmem:[#allocation8 + $0x40] sm:$0xff] }
  0xbe   : > { %1608 = vmatprep.subr.bf16.mxu0 %v1607_v24  ;;  %v1663_v23 = vpack.c.bf16 %v631_v22, %v630_v21 }
  0xc1   : > { %1610 = vmatpush3.bf16.msra.mxu0 %v1607_v24  ;;  %v632_v24 = vld [vmem:[#allocation8 + $0x50] sm:$0xff] }
  0xc2   : > { %1612 = vmatprep.subr.bf16.mxu0 %v1611_v27  ;;  %v1667_v26 = vpack.c.bf16 %v633_v25, %v632_v24 }
  0xc5   : > { %1614 = vmatpush3.bf16.msra.mxu0 %v1611_v27  ;;  %v634_v27 = vld [vmem:[#allocation8 + $0x60] sm:$0xff] }
  0xc6   : > { %1712 = vmatprep.subr.bf16.mxu0 %v1711_v44 }
  0xc8   : > { %1377 = vmatmul.mubr.f32.vlgmr.msra.gmra.mrb[0].mxu0 %v2207_v28 }
  0xc9   : > { %1516 = vmatprep.mubr.f32.mxu0 %v510_v9  ;;  %1714 = vmatpush3.bf16.msra.mxu0 %v1711_v44  ;;  %v624_v9 = vld [vmem:[#allocation8 + $0x10] sm:$0xff]  ;;  %v817_v44 = vld [vmem:[#allocation8 + $0x138] sm:$0xff] }
  0xca   : > { %1716 = vmatprep.subr.bf16.mxu0 %v1715_v47  ;;  %v1651_v13 = vpack.c.bf16 %v625_v10, %v624_v9  ;;  %v1691_v45 = vpack.c.bf16 %v817_v44, %v816_v43 }
  0xcd   : > { %1718 = vmatpush3.bf16.msra.mxu0 %v1715_v47  ;;  %v819_v47 = vld [vmem:[#allocation8 + $0x148] sm:$0xff] }
  0xce   : > { %1720 = vmatprep.subr.bf16.mxu0 %v1719_v50  ;;  %v1695_v48 = vpack.c.bf16 %v819_v47, %v818_v46 }
  0xd1   : > { %1722 = vmatpush3.bf16.msra.mxu0 %v1719_v50  ;;  %v821_v50 = vld [vmem:[#allocation8 + $0x158] sm:$0xff] }
  0xd2   : > { %1724 = vmatprep.subr.bf16.mxu0 %v1723_v53  ;;  %v1699_v51 = vpack.c.bf16 %v821_v50, %v820_v49 }
  0xd5   : > { %1726 = vmatpush3.bf16.msra.mxu0 %v1723_v53  ;;  %v823_v53 = vld [vmem:[#allocation8 + $0x168] sm:$0xff] }
  0xd6   : > { %1728 = vmatprep.subr.bf16.mxu0 %v1727_v56  ;;  %v1703_v54 = vpack.c.bf16 %v823_v53, %v822_v52 }
  0xd9   : > { %1730 = vmatpush3.bf16.msra.mxu0 %v1727_v56  ;;  %v825_v56 = vld [vmem:[#allocation8 + $0x178] sm:$0xff] }
  0xda   : > { %1732 = vmatprep.subr.bf16.mxu0 %v1731_v59  ;;  %v1707_v57 = vpack.c.bf16 %v825_v56, %v824_v55 }
  0xdd   : > { %1734 = vmatpush3.bf16.msra.mxu0 %v1731_v59 }
  0xde   : > { %1736 = vmatprep.subr.bf16.mxu0 %v1735_v62 }
  0xe1   : > { %1738 = vmatpush3.bf16.msra.mxu0 %v1735_v62 }
  0xe2   : > { %1740 = vmatprep.subr.bf16.mxu0 %v1739_v1 }
  0xe5   : > { %1742 = vmatpush3.bf16.msra.mxu0 %v1739_v1 }
  0xe8   : > { %1517 = vmatmul.mubr.f32.vlgmr.msra.gmra.mrb[2].mxu0 %v2207_v28  ;;  %v635_v28 = vld [vmem:[#allocation8 + $0x68] sm:$0xff] }
  0xe9   : > { %v1671_v29 = vpack.c.bf16 %v635_v28, %v634_v27 }
 0x19b   : > { %v1378_v3 = vpop.f32.mrb[0].mxu0 }
 0x19c   : > { %v2214_v4 = vadd.f32 %v1378_v3, %v1139_v2  ;;  %v595_v5 = vpop.f32.mrb[1].mxu0 }
 0x19d   : > { %v613_v6 = vadd.f32 %v1139_v2, %v595_v5 }
 0x19e   : > { %v616_v7 = vmax.f32 %v2214_v4, 0.0 }
 0x19f   : > { %v615_v8 = vmax.f32 %v613_v6, 0.0 }
 0x1a0   : > { %619 = vst [vmem:[#allocation2 + $0xc] sm:$0xff] %v616_v7 }
 0x1a1   : > { %618 = vst [vmem:[#allocation2 + $0x4] sm:$0xff] %v615_v8 }
 0x1a8   : > { %v638_v11 = vld [vmem:[#allocation2 + $0x2] sm:$0xff]  ;;  %v639_v12 = vld [vmem:[#allocation2 + $0xa] sm:$0xff] }
 0x1a9   : > { %1411 = vmatprep.mubr.f32.mxu1 %v638_v11  ;;  %v620_v16 = vld [vmem:[#allocation2] sm:$0xff]  ;;  %v621_v39 = vld [vmem:[#allocation2 + $0x8] sm:$0xff] }
 0x1aa   : > { %1412 = vmatmul.mubr.f32.vlgmr.msra.gmra.mrb[0].mxu1 %v639_v12 }
 0x1ab   : > { %1650 = vmatpush3.bf16.msra.mxu1 %v1647_v41  ;;  %1446 = vmatprep.mubr.f32.mxu1 %v620_v16  ;;  %v815_v41 = vld [vmem:[#allocation8 + $0x128] sm:$0xff] }
 0x1ac   : > { %1652 = vmatprep.subr.bf16.mxu1 %v1651_v13  ;;  %v1687_v42 = vpack.c.bf16 %v815_v41, %v814_v40 }
 0x1af   : > { %1654 = vmatpush3.bf16.msra.mxu1 %v1651_v13 }
 0x1b0   : > { %1656 = vmatprep.subr.bf16.mxu1 %v1655_v17 }
 0x1b3   : > { %1658 = vmatpush3.bf16.msra.mxu1 %v1655_v17 }
 0x1b4   : > { %1660 = vmatprep.subr.bf16.mxu1 %v1659_v20 }
 0x1b7   : > { %1662 = vmatpush3.bf16.msra.mxu1 %v1659_v20 }
 0x1b8   : > { %1664 = vmatprep.subr.bf16.mxu1 %v1663_v23 }
 0x1bb   : > { %1666 = vmatpush3.bf16.msra.mxu1 %v1663_v23  ;;  %v1518_v58 = vpop.f32.mrb[2].mxu0 }
 0x1bc   : > { %1668 = vmatprep.subr.bf16.mxu1 %v1667_v26  ;;  %v1005_v59 = vpop.f32.mrb[3].mxu0  ;;  %v1011_v1 = vadd.f32 %v1518_v58, %v1141_v61 }
 0x1bd   : > { %v1006_v3 = vadd.f32 %v1141_v61, %v1005_v59 }
 0x1bf   : > { %1670 = vmatpush3.bf16.msra.mxu1 %v1667_v26 }
 0x1c0   : > { %1672 = vmatprep.subr.bf16.mxu1 %v1671_v29 }
 0x1c3   : > { %1674 = vmatpush3.bf16.msra.mxu1 %v1671_v29 }
 0x1c4   : > { %1676 = vmatprep.subr.bf16.mxu1 %v1675_v32 }
 0x1c7   : > { %1678 = vmatpush3.bf16.msra.mxu1 %v1675_v32 }
 0x1c8   : > { %1680 = vmatprep.subr.bf16.mxu1 %v1679_v35 }
 0x1ca   : > { %1447 = vmatmul.mubr.f32.vlgmr.msra.gmra.mrb[0].mxu1 %v621_v39 }
 0x1cb   : > { %1682 = vmatpush3.bf16.msra.mxu1 %v1679_v35  ;;  %1481 = vmatprep.mubr.f32.mxu1 %v615_v8 }
 0x1cc   : > { %1684 = vmatprep.subr.bf16.mxu1 %v1683_v38 }
 0x1cf   : > { %1686 = vmatpush3.bf16.msra.mxu1 %v1683_v38 }
 0x1d0   : > { %1688 = vmatprep.subr.bf16.mxu1 %v1687_v42 }
 0x1d3   : > { %1690 = vmatpush3.bf16.msra.mxu1 %v1687_v42 }
 0x1d4   : > { %1692 = vmatprep.subr.bf16.mxu1 %v1691_v45 }
 0x1d7   : > { %1694 = vmatpush3.bf16.msra.mxu1 %v1691_v45 }
 0x1d8   : > { %1696 = vmatprep.subr.bf16.mxu1 %v1695_v48 }
 0x1db   : > { %1698 = vmatpush3.bf16.msra.mxu1 %v1695_v48 }
 0x1dc   : > { %1700 = vmatprep.subr.bf16.mxu1 %v1699_v51 }
 0x1df   : > { %1702 = vmatpush3.bf16.msra.mxu1 %v1699_v51 }
 0x1e0   : > { %1704 = vmatprep.subr.bf16.mxu1 %v1703_v54 }
 0x1e3   : > { %1706 = vmatpush3.bf16.msra.mxu1 %v1703_v54 }
 0x1e4   : > { %1708 = vmatprep.subr.bf16.mxu1 %v1707_v57 }
 0x1e7   : > { %1710 = vmatpush3.bf16.msra.mxu1 %v1707_v57 }
 0x1ea   : > { %1482 = vmatmul.mubr.f32.vlgmr.msra.gmra.mrb[0].mxu1 %v616_v7 }
 0x2bd   : > { %v1483_v62 = vpop.f32.mrb[0].mxu1 }
 0x2be   : > { %v911_v63 = vadd.f32 %v1483_v62, %v1140_v60  ;;  %v892_v0 = vpop.f32.mrb[1].mxu1 }
 0x2bf   : > { %v910_v2 = vadd.f32 %v1140_v60, %v892_v0 }
 0x2c0   : > { %v913_v4 = vmax.f32 %v911_v63, 0.0 }
 0x2c1   : > { %v912_v5 = vmax.f32 %v910_v2, 0.0 }
 0x2c2   : > { %v1015_v6 = vadd.f32 %v1011_v1, %v913_v4 }
 0x2c3   : > { %v1014_v7 = vadd.f32 %v1006_v3, %v912_v5 }
 0x2c4   : > { %v1017_v8 = vmax.f32 %v1015_v6, 0.0 }
 0x2c5   : > { %v1016_v9 = vmax.f32 %v1014_v7, 0.0 }
 0x2c6   : > { %1019 = vst [vmem:[%s317_s22 + $0x8] sm:$0xff] %v1017_v8 }
 0x2c7   : > { %1018 = vst [vmem:[%s317_s22] sm:$0xff] %v1016_v9 }
 0x2c8   : > { %1924 = shalt.err (!%p1921_p9)
}
 0x2c9   : > { %s1925_s10 = scalar_lea.hbm %s2234_s23, 256  ;;  %s1929_s9 = scalar_lea.hbm %s2285_s8, 512 }
 0x2ca   : > { %p1926_p2 = scmp.ne.s32.totalorder %s2234_s23, %s1925_s10  ;;  %p1930_p5 = scmp.lt.u32.totalorder %s2234_s23, %s2285_s8 }
 0x2cb   : > { %p1931_p10 = scmp.lt.u32.totalorder %s1929_s9, %s1925_s10  ;;  %p1933_p12 = scmp.lt.u32.totalorder %s1925_s10, %s2234_s23 }
 0x2cc   : > { %p1927_p0 = pnand %p1926_p2, %p2305_p7 }
 0x2cd   : > { %p1932_p4 = por %p1931_p10, %p1930_p5 }
 0x2ce   : > { %p1928_p3 = pneg %p1927_p0 }
 0x2cf   : > { %p1934_p8 = por %p1933_p12, %p1932_p4 }
 0x2d1   : > { %p1935_p11 = pnand %p1934_p8, %p1928_p3 }
 0x2d3   : > { %1938 = shalt.err (!%p1935_p11)
}
 0x2d4   : > { %s1990_s20 = smov 128   ;;  %s1991_s22 = smov 8  }
 0x2d5   : > { %1764 = dma.vmem_to_hbm [thread:$0]  (%p2305_p7), %s2229_s18, 256, %s2234_s23, %s2236_s16, %s1990_s20, %s1990_s20, %s1991_s22  }
 0x2d6 PF: > { %p1786_p13 = scmp.ge.s32.totalorder %s1981_s29, 2  ;;  %s1049_s21 = sand.u32 1, %s1969_s26  }
 0x2d7   : > { %p2306_p1 = scmp.ne.s32.totalorder %s2296_s15, 0  ;;  %s1050_s28 = scalar_lea.sflag [#allocation7], %s1049_s21 }
 0x2d9   : > { %p1777_p6 = pnand %p1786_p13, %p2306_p1 }
 0x2db   : > { %1964 = dma.done.wait (!%p1777_p6), %s1050_s28, 256  }
 0x2dc   : > { %1966 = vsyncadd (!%p1777_p6), %s1050_s28, 4294967040  ;;  %s2307_s29 = sld [smem:[#allocation16_spill]]  ;;  %s2308_s19 = sld [smem:[#allocation15_spill]] }
 0x2dd   : > { %s2309_s28 = sld [smem:[#allocation17_spill]]  ;;  %s2310_s26 = smov %s1973_s27 }
 0x2e2   : > { %p21_p9 = scmp.ge.s32.totalorder %s2307_s29, 4   ;;  %s2311_s27 = smov %s2308_s19 }
 0x2e4   :  { %23 = sbr.rel (!%p21_p9) target bundleno = 5 (0x5), region = 100 }
 0x2eb   :  { %1055 = vsyncpa [#allocation6], 1 }
 0x2ec   :  { %1057 = vsyncpa [#allocation6 + $0x1], 1 }
 0x2ed   :  { %1058 = vsyncpa [#allocation9], 1 }
 0x2ee   :  { %1059 = vsyncpa [#allocation7], 1 }
 0x2ef   :  { %1061 = vsyncpa [#allocation7 + $0x1], 1 }

</bundles_post_ra>
